<compile_context>
chip_gen: v7x
topology: tpu7x:2x2x1
jax: 0.10.0
libtpu: 0.0.40
codegen_flags: <defaults>
</compile_context>

<pallas_src>
import jax
import jax.numpy as jnp
from jax.experimental import pallas as pl
from jax.experimental.pallas import tpu as pltpu

NUM_FEATURES = 2
HIDDEN = 10
NUM_CLASSES = 2

_MIN_TILE = 8 * 128          # lane-dense tile granularity (sublane*lane)
_MAX_BATCH_TILE = 64 * 1024  # rows per grid step: 512 KiB/buffer, fits all gens


def mlp_softmax_kernel(x_ref, w1_ref, b1_ref, w2_ref, b2_ref, o_ref):
    """x_ref: (F, TB) VMEM, batch on the lane axis.  Weights in SMEM in native
    PyTorch layouts: w1 (H, F), b1 (H,), w2 (C, H), b2 (C,), read as scalars.
    o_ref: (C, TB) VMEM."""
    x0 = x_ref[0:1, :]                        # (1, TB)
    x1 = x_ref[1:2, :]                        # (1, TB)
    # 2-class softmax only needs the logit difference z = logit1 - logit0.
    z = jnp.zeros_like(x0) + (b2_ref[1] - b2_ref[0])
    # fc1 + ReLU + fc2-difference, fully unrolled scalar*vector FMA chain (VPU).
    for j in range(HIDDEN):
        h_j = jnp.maximum(x0 * w1_ref[j, 0] + x1 * w1_ref[j, 1] + b1_ref[j], 0.0)
        z = z + h_j * (w2_ref[1, j] - w2_ref[0, j])
    # softmax([l0, l1], dim=1) == [1 - sigmoid(z), sigmoid(z)]; the
    # 1/(1+exp(-z)) form saturates cleanly to 0/1 in f32 (no NaN/inf).
    p1 = pl.reciprocal(1.0 + jnp.exp(-z))     # exact recip: keeps 1e-5 tolerance
    o_ref[0:1, :] = (1.0 - p1).astype(o_ref.dtype)
    o_ref[1:2, :] = p1.astype(o_ref.dtype)


def _batch_tile(B):
    """Pick the lane-axis tile size.

    Small B: one block equal to the full array dim (always a legal block shape).
    Large B: >= 2 tiles (so both v7x TensorCores get work), each a multiple of
    8*128 lanes, capped at _MAX_BATCH_TILE."""
    if B < 2 * _MIN_TILE:
        return B
    half = -(-B // 2)                          # ceil(B / 2)
    tb = -(-half // _MIN_TILE) * _MIN_TILE     # round up to 8*128
    return min(tb, _MAX_BATCH_TILE)


@jax.jit
def net_forward(x, w1, b1, w2, b2):
    """x: (B, NUM_FEATURES) f32.  Weights in PyTorch layout:
       w1: (HIDDEN, NUM_FEATURES), b1: (HIDDEN,),
       w2: (NUM_CLASSES, HIDDEN),  b2: (NUM_CLASSES,).
    Returns (B, NUM_CLASSES) softmax probabilities (dim=1)."""
    B = x.shape[0]
    xt = x.T                                   # (F, B): batch on the lane axis
    tb = _batch_tile(B)
    grid = (pl.cdiv(B, tb),)                   # tail block writes are masked by
                                               # Pallas -> no jnp.pad of x

    smem = pltpu.MemorySpace.SMEM
    out = pl.pallas_call(
        mlp_softmax_kernel,
        out_shape=jax.ShapeDtypeStruct((NUM_CLASSES, B), jnp.float32),
        grid=grid,
        in_specs=[
            pl.BlockSpec((NUM_FEATURES, tb), lambda i: (0, i)),  # x tile (VMEM)
            pl.BlockSpec(memory_space=smem),   # w1 (H, F) — whole array, resident
            pl.BlockSpec(memory_space=smem),   # b1 (H,)
            pl.BlockSpec(memory_space=smem),   # w2 (C, H)
            pl.BlockSpec(memory_space=smem),   # b2 (C,)
        ],
        out_specs=pl.BlockSpec((NUM_CLASSES, tb), lambda i: (0, i)),
        compiler_params=pltpu.CompilerParams(
            dimension_semantics=("parallel",)),  # shard batch grid across TCs
        cost_estimate=pl.CostEstimate(
            flops=80 * B,
            transcendentals=B,
            bytes_accessed=(NUM_FEATURES + NUM_CLASSES) * 4 * B + 256),
    )(xt, w1, b1, w2, b2)
    return out.T                               # (B, C), PyTorch output layout


def init_params(key):
    # Deterministic init mimicking nn.Linear (uniform in +/- 1/sqrt(fan_in)).
    k1, k2, k3, k4 = jax.random.split(key, 4)
    bound1 = 1.0 / (NUM_FEATURES ** 0.5)
    bound2 = 1.0 / (HIDDEN ** 0.5)
    w1 = jax.random.uniform(k1, (HIDDEN, NUM_FEATURES), jnp.float32, -bound1, bound1)
    b1 = jax.random.uniform(k2, (HIDDEN,), jnp.float32, -bound1, bound1)
    w2 = jax.random.uniform(k3, (NUM_CLASSES, HIDDEN), jnp.float32, -bound2, bound2)
    b2 = jax.random.uniform(k4, (NUM_CLASSES,), jnp.float32, -bound2, bound2)
    return w1, b1, w2, b2


def _reference(x, w1, b1, w2, b2):
    h = jnp.maximum(x @ w1.T + b1, 0.0)
    logits = h @ w2.T + b2
    return jax.nn.softmax(logits, axis=1)


if __name__ == "__main__":
    key = jax.random.PRNGKey(0)
    kx, kx2, kp = jax.random.split(key, 3)
    w1, b1, w2, b2 = init_params(kp)

    # Small primary test (batch=2 features=2 per the module spec; use batch=8).
    batch = 8
    x = jax.random.normal(kx, (batch, NUM_FEATURES), jnp.float32)
    out = jax.block_until_ready(net_forward(x, w1, b1, w2, b2))
    ref = _reference(x, w1, b1, w2, b2)
    assert out.shape == (batch, NUM_CLASSES)
    assert jnp.allclose(out, ref, atol=1e-5, rtol=1e-5)
    assert jnp.allclose(jnp.sum(out, axis=1), 1.0, atol=1e-5)

    # Secondary test exercising the multi-tile grid + masked (ragged) tail block.
    batch2 = 2500
    x2 = jax.random.normal(kx2, (batch2, NUM_FEATURES), jnp.float32)
    out2 = jax.block_until_ready(net_forward(x2, w1, b1, w2, b2))
    ref2 = _reference(x2, w1, b1, w2, b2)
    assert out2.shape == (batch2, NUM_CLASSES)
    assert jnp.allclose(out2, ref2, atol=1e-5, rtol=1e-5)

    print("KERNEL_OK")
</pallas_src>

<mosaic_0001>
module attributes {stable_mosaic.version = 11 : i64} {
  func.func @mlp_softmax_kernel(%arg0: i32, %arg1: memref<2x8xf32, #tpu.memory_space<vmem>>, %arg2: memref<10x2xf32, #tpu.memory_space<smem>>, %arg3: memref<10xf32, #tpu.memory_space<smem>>, %arg4: memref<2x10xf32, #tpu.memory_space<smem>>, %arg5: memref<2xf32, #tpu.memory_space<smem>>, %arg6: memref<2x8xf32, #tpu.memory_space<vmem>>) attributes {dimension_semantics = [#tpu.dimension_semantics<parallel>], iteration_bounds = array<i64: 1>, scalar_prefetch = 0 : i64, scratch_operands = 0 : i64, tpu.core_type = #tpu.core_type<tc>, window_params = [{transform_indices = @transform_0, window_bounds = array<i64: 2, 8>}, {transform_indices = @transform_1, window_bounds = array<i64: 10, 2>}, {transform_indices = @transform_2, window_bounds = array<i64: 10>}, {transform_indices = @transform_3, window_bounds = array<i64: 2, 10>}, {transform_indices = @transform_4, window_bounds = array<i64: 2>}, {transform_indices = @transform_5, window_bounds = array<i64: 2, 8>}]} {
    %c0 = arith.constant 0 : index
    %c0_0 = arith.constant 0 : index
    %0 = vector.load %arg1[%c0, %c0_0] : memref<2x8xf32, #tpu.memory_space<vmem>>, vector<1x8xf32>
    %c1 = arith.constant 1 : index
    %c0_1 = arith.constant 0 : index
    %1 = vector.load %arg1[%c1, %c0_1] : memref<2x8xf32, #tpu.memory_space<vmem>>, vector<1x8xf32>
    %cst = arith.constant 0.000000e+00 : f32
    %2 = vector.broadcast %cst : f32 to vector<1x8xf32>
    %c1_2 = arith.constant 1 : index
    %3 = memref.load %arg5[%c1_2] : memref<2xf32, #tpu.memory_space<smem>>
    %c0_3 = arith.constant 0 : index
    %4 = memref.load %arg5[%c0_3] : memref<2xf32, #tpu.memory_space<smem>>
    %5 = arith.subf %3, %4 : f32
    %6 = vector.broadcast %5 : f32 to vector<1x8xf32>
    %7 = arith.addf %2, %6 : vector<1x8xf32>
    %c0_4 = arith.constant 0 : index
    %c0_5 = arith.constant 0 : index
    %8 = memref.load %arg2[%c0_4, %c0_5] : memref<10x2xf32, #tpu.memory_space<smem>>
    %9 = vector.broadcast %8 : f32 to vector<1x8xf32>
    %10 = arith.mulf %0, %9 : vector<1x8xf32>
    %c0_6 = arith.constant 0 : index
    %c1_7 = arith.constant 1 : index
    %11 = memref.load %arg2[%c0_6, %c1_7] : memref<10x2xf32, #tpu.memory_space<smem>>
    %12 = vector.broadcast %11 : f32 to vector<1x8xf32>
    %13 = arith.mulf %1, %12 : vector<1x8xf32>
    %14 = arith.addf %10, %13 : vector<1x8xf32>
    %c0_8 = arith.constant 0 : index
    %15 = memref.load %arg3[%c0_8] : memref<10xf32, #tpu.memory_space<smem>>
    %16 = vector.broadcast %15 : f32 to vector<1x8xf32>
    %17 = arith.addf %14, %16 : vector<1x8xf32>
    %cst_9 = arith.constant 0.000000e+00 : f32
    %18 = vector.broadcast %cst_9 : f32 to vector<1x8xf32>
    %19 = arith.maximumf %17, %18 : vector<1x8xf32>
    %c1_10 = arith.constant 1 : index
    %c0_11 = arith.constant 0 : index
    %20 = memref.load %arg4[%c1_10, %c0_11] : memref<2x10xf32, #tpu.memory_space<smem>>
    %c0_12 = arith.constant 0 : index
    %c0_13 = arith.constant 0 : index
    %21 = memref.load %arg4[%c0_12, %c0_13] : memref<2x10xf32, #tpu.memory_space<smem>>
    %22 = arith.subf %20, %21 : f32
    %23 = vector.broadcast %22 : f32 to vector<1x8xf32>
    %24 = arith.mulf %19, %23 : vector<1x8xf32>
    %25 = arith.addf %7, %24 : vector<1x8xf32>
    %c1_14 = arith.constant 1 : index
    %c0_15 = arith.constant 0 : index
    %26 = memref.load %arg2[%c1_14, %c0_15] : memref<10x2xf32, #tpu.memory_space<smem>>
    %27 = vector.broadcast %26 : f32 to vector<1x8xf32>
    %28 = arith.mulf %0, %27 : vector<1x8xf32>
    %c1_16 = arith.constant 1 : index
    %c1_17 = arith.constant 1 : index
    %29 = memref.load %arg2[%c1_16, %c1_17] : memref<10x2xf32, #tpu.memory_space<smem>>
    %30 = vector.broadcast %29 : f32 to vector<1x8xf32>
    %31 = arith.mulf %1, %30 : vector<1x8xf32>
    %32 = arith.addf %28, %31 : vector<1x8xf32>
    %c1_18 = arith.constant 1 : index
    %33 = memref.load %arg3[%c1_18] : memref<10xf32, #tpu.memory_space<smem>>
    %34 = vector.broadcast %33 : f32 to vector<1x8xf32>
    %35 = arith.addf %32, %34 : vector<1x8xf32>
    %cst_19 = arith.constant 0.000000e+00 : f32
    %36 = vector.broadcast %cst_19 : f32 to vector<1x8xf32>
    %37 = arith.maximumf %35, %36 : vector<1x8xf32>
    %c1_20 = arith.constant 1 : index
    %c1_21 = arith.constant 1 : index
    %38 = memref.load %arg4[%c1_20, %c1_21] : memref<2x10xf32, #tpu.memory_space<smem>>
    %c0_22 = arith.constant 0 : index
    %c1_23 = arith.constant 1 : index
    %39 = memref.load %arg4[%c0_22, %c1_23] : memref<2x10xf32, #tpu.memory_space<smem>>
    %40 = arith.subf %38, %39 : f32
    %41 = vector.broadcast %40 : f32 to vector<1x8xf32>
    %42 = arith.mulf %37, %41 : vector<1x8xf32>
    %43 = arith.addf %25, %42 : vector<1x8xf32>
    %c2 = arith.constant 2 : index
    %c0_24 = arith.constant 0 : index
    %44 = memref.load %arg2[%c2, %c0_24] : memref<10x2xf32, #tpu.memory_space<smem>>
    %45 = vector.broadcast %44 : f32 to vector<1x8xf32>
    %46 = arith.mulf %0, %45 : vector<1x8xf32>
    %c2_25 = arith.constant 2 : index
    %c1_26 = arith.constant 1 : index
    %47 = memref.load %arg2[%c2_25, %c1_26] : memref<10x2xf32, #tpu.memory_space<smem>>
    %48 = vector.broadcast %47 : f32 to vector<1x8xf32>
    %49 = arith.mulf %1, %48 : vector<1x8xf32>
    %50 = arith.addf %46, %49 : vector<1x8xf32>
    %c2_27 = arith.constant 2 : index
    %51 = memref.load %arg3[%c2_27] : memref<10xf32, #tpu.memory_space<smem>>
    %52 = vector.broadcast %51 : f32 to vector<1x8xf32>
    %53 = arith.addf %50, %52 : vector<1x8xf32>
    %cst_28 = arith.constant 0.000000e+00 : f32
    %54 = vector.broadcast %cst_28 : f32 to vector<1x8xf32>
    %55 = arith.maximumf %53, %54 : vector<1x8xf32>
    %c1_29 = arith.constant 1 : index
    %c2_30 = arith.constant 2 : index
    %56 = memref.load %arg4[%c1_29, %c2_30] : memref<2x10xf32, #tpu.memory_space<smem>>
    %c0_31 = arith.constant 0 : index
    %c2_32 = arith.constant 2 : index
    %57 = memref.load %arg4[%c0_31, %c2_32] : memref<2x10xf32, #tpu.memory_space<smem>>
    %58 = arith.subf %56, %57 : f32
    %59 = vector.broadcast %58 : f32 to vector<1x8xf32>
    %60 = arith.mulf %55, %59 : vector<1x8xf32>
    %61 = arith.addf %43, %60 : vector<1x8xf32>
    %c3 = arith.constant 3 : index
    %c0_33 = arith.constant 0 : index
    %62 = memref.load %arg2[%c3, %c0_33] : memref<10x2xf32, #tpu.memory_space<smem>>
    %63 = vector.broadcast %62 : f32 to vector<1x8xf32>
    %64 = arith.mulf %0, %63 : vector<1x8xf32>
    %c3_34 = arith.constant 3 : index
    %c1_35 = arith.constant 1 : index
    %65 = memref.load %arg2[%c3_34, %c1_35] : memref<10x2xf32, #tpu.memory_space<smem>>
    %66 = vector.broadcast %65 : f32 to vector<1x8xf32>
    %67 = arith.mulf %1, %66 : vector<1x8xf32>
    %68 = arith.addf %64, %67 : vector<1x8xf32>
    %c3_36 = arith.constant 3 : index
    %69 = memref.load %arg3[%c3_36] : memref<10xf32, #tpu.memory_space<smem>>
    %70 = vector.broadcast %69 : f32 to vector<1x8xf32>
    %71 = arith.addf %68, %70 : vector<1x8xf32>
    %cst_37 = arith.constant 0.000000e+00 : f32
    %72 = vector.broadcast %cst_37 : f32 to vector<1x8xf32>
    %73 = arith.maximumf %71, %72 : vector<1x8xf32>
    %c1_38 = arith.constant 1 : index
    %c3_39 = arith.constant 3 : index
    %74 = memref.load %arg4[%c1_38, %c3_39] : memref<2x10xf32, #tpu.memory_space<smem>>
    %c0_40 = arith.constant 0 : index
    %c3_41 = arith.constant 3 : index
    %75 = memref.load %arg4[%c0_40, %c3_41] : memref<2x10xf32, #tpu.memory_space<smem>>
    %76 = arith.subf %74, %75 : f32
    %77 = vector.broadcast %76 : f32 to vector<1x8xf32>
    %78 = arith.mulf %73, %77 : vector<1x8xf32>
    %79 = arith.addf %61, %78 : vector<1x8xf32>
    %c4 = arith.constant 4 : index
    %c0_42 = arith.constant 0 : index
    %80 = memref.load %arg2[%c4, %c0_42] : memref<10x2xf32, #tpu.memory_space<smem>>
    %81 = vector.broadcast %80 : f32 to vector<1x8xf32>
    %82 = arith.mulf %0, %81 : vector<1x8xf32>
    %c4_43 = arith.constant 4 : index
    %c1_44 = arith.constant 1 : index
    %83 = memref.load %arg2[%c4_43, %c1_44] : memref<10x2xf32, #tpu.memory_space<smem>>
    %84 = vector.broadcast %83 : f32 to vector<1x8xf32>
    %85 = arith.mulf %1, %84 : vector<1x8xf32>
    %86 = arith.addf %82, %85 : vector<1x8xf32>
    %c4_45 = arith.constant 4 : index
    %87 = memref.load %arg3[%c4_45] : memref<10xf32, #tpu.memory_space<smem>>
    %88 = vector.broadcast %87 : f32 to vector<1x8xf32>
    %89 = arith.addf %86, %88 : vector<1x8xf32>
    %cst_46 = arith.constant 0.000000e+00 : f32
    %90 = vector.broadcast %cst_46 : f32 to vector<1x8xf32>
    %91 = arith.maximumf %89, %90 : vector<1x8xf32>
    %c1_47 = arith.constant 1 : index
    %c4_48 = arith.constant 4 : index
    %92 = memref.load %arg4[%c1_47, %c4_48] : memref<2x10xf32, #tpu.memory_space<smem>>
    %c0_49 = arith.constant 0 : index
    %c4_50 = arith.constant 4 : index
    %93 = memref.load %arg4[%c0_49, %c4_50] : memref<2x10xf32, #tpu.memory_space<smem>>
    %94 = arith.subf %92, %93 : f32
    %95 = vector.broadcast %94 : f32 to vector<1x8xf32>
    %96 = arith.mulf %91, %95 : vector<1x8xf32>
    %97 = arith.addf %79, %96 : vector<1x8xf32>
    %c5 = arith.constant 5 : index
    %c0_51 = arith.constant 0 : index
    %98 = memref.load %arg2[%c5, %c0_51] : memref<10x2xf32, #tpu.memory_space<smem>>
    %99 = vector.broadcast %98 : f32 to vector<1x8xf32>
    %100 = arith.mulf %0, %99 : vector<1x8xf32>
    %c5_52 = arith.constant 5 : index
    %c1_53 = arith.constant 1 : index
    %101 = memref.load %arg2[%c5_52, %c1_53] : memref<10x2xf32, #tpu.memory_space<smem>>
    %102 = vector.broadcast %101 : f32 to vector<1x8xf32>
    %103 = arith.mulf %1, %102 : vector<1x8xf32>
    %104 = arith.addf %100, %103 : vector<1x8xf32>
    %c5_54 = arith.constant 5 : index
    %105 = memref.load %arg3[%c5_54] : memref<10xf32, #tpu.memory_space<smem>>
    %106 = vector.broadcast %105 : f32 to vector<1x8xf32>
    %107 = arith.addf %104, %106 : vector<1x8xf32>
    %cst_55 = arith.constant 0.000000e+00 : f32
    %108 = vector.broadcast %cst_55 : f32 to vector<1x8xf32>
    %109 = arith.maximumf %107, %108 : vector<1x8xf32>
    %c1_56 = arith.constant 1 : index
    %c5_57 = arith.constant 5 : index
    %110 = memref.load %arg4[%c1_56, %c5_57] : memref<2x10xf32, #tpu.memory_space<smem>>
    %c0_58 = arith.constant 0 : index
    %c5_59 = arith.constant 5 : index
    %111 = memref.load %arg4[%c0_58, %c5_59] : memref<2x10xf32, #tpu.memory_space<smem>>
    %112 = arith.subf %110, %111 : f32
    %113 = vector.broadcast %112 : f32 to vector<1x8xf32>
    %114 = arith.mulf %109, %113 : vector<1x8xf32>
    %115 = arith.addf %97, %114 : vector<1x8xf32>
    %c6 = arith.constant 6 : index
    %c0_60 = arith.constant 0 : index
    %116 = memref.load %arg2[%c6, %c0_60] : memref<10x2xf32, #tpu.memory_space<smem>>
    %117 = vector.broadcast %116 : f32 to vector<1x8xf32>
    %118 = arith.mulf %0, %117 : vector<1x8xf32>
    %c6_61 = arith.constant 6 : index
    %c1_62 = arith.constant 1 : index
    %119 = memref.load %arg2[%c6_61, %c1_62] : memref<10x2xf32, #tpu.memory_space<smem>>
    %120 = vector.broadcast %119 : f32 to vector<1x8xf32>
    %121 = arith.mulf %1, %120 : vector<1x8xf32>
    %122 = arith.addf %118, %121 : vector<1x8xf32>
    %c6_63 = arith.constant 6 : index
    %123 = memref.load %arg3[%c6_63] : memref<10xf32, #tpu.memory_space<smem>>
    %124 = vector.broadcast %123 : f32 to vector<1x8xf32>
    %125 = arith.addf %122, %124 : vector<1x8xf32>
    %cst_64 = arith.constant 0.000000e+00 : f32
    %126 = vector.broadcast %cst_64 : f32 to vector<1x8xf32>
    %127 = arith.maximumf %125, %126 : vector<1x8xf32>
    %c1_65 = arith.constant 1 : index
    %c6_66 = arith.constant 6 : index
    %128 = memref.load %arg4[%c1_65, %c6_66] : memref<2x10xf32, #tpu.memory_space<smem>>
    %c0_67 = arith.constant 0 : index
    %c6_68 = arith.constant 6 : index
    %129 = memref.load %arg4[%c0_67, %c6_68] : memref<2x10xf32, #tpu.memory_space<smem>>
    %130 = arith.subf %128, %129 : f32
    %131 = vector.broadcast %130 : f32 to vector<1x8xf32>
    %132 = arith.mulf %127, %131 : vector<1x8xf32>
    %133 = arith.addf %115, %132 : vector<1x8xf32>
    %c7 = arith.constant 7 : index
    %c0_69 = arith.constant 0 : index
    %134 = memref.load %arg2[%c7, %c0_69] : memref<10x2xf32, #tpu.memory_space<smem>>
    %135 = vector.broadcast %134 : f32 to vector<1x8xf32>
    %136 = arith.mulf %0, %135 : vector<1x8xf32>
    %c7_70 = arith.constant 7 : index
    %c1_71 = arith.constant 1 : index
    %137 = memref.load %arg2[%c7_70, %c1_71] : memref<10x2xf32, #tpu.memory_space<smem>>
    %138 = vector.broadcast %137 : f32 to vector<1x8xf32>
    %139 = arith.mulf %1, %138 : vector<1x8xf32>
    %140 = arith.addf %136, %139 : vector<1x8xf32>
    %c7_72 = arith.constant 7 : index
    %141 = memref.load %arg3[%c7_72] : memref<10xf32, #tpu.memory_space<smem>>
    %142 = vector.broadcast %141 : f32 to vector<1x8xf32>
    %143 = arith.addf %140, %142 : vector<1x8xf32>
    %cst_73 = arith.constant 0.000000e+00 : f32
    %144 = vector.broadcast %cst_73 : f32 to vector<1x8xf32>
    %145 = arith.maximumf %143, %144 : vector<1x8xf32>
    %c1_74 = arith.constant 1 : index
    %c7_75 = arith.constant 7 : index
    %146 = memref.load %arg4[%c1_74, %c7_75] : memref<2x10xf32, #tpu.memory_space<smem>>
    %c0_76 = arith.constant 0 : index
    %c7_77 = arith.constant 7 : index
    %147 = memref.load %arg4[%c0_76, %c7_77] : memref<2x10xf32, #tpu.memory_space<smem>>
    %148 = arith.subf %146, %147 : f32
    %149 = vector.broadcast %148 : f32 to vector<1x8xf32>
    %150 = arith.mulf %145, %149 : vector<1x8xf32>
    %151 = arith.addf %133, %150 : vector<1x8xf32>
    %c8 = arith.constant 8 : index
    %c0_78 = arith.constant 0 : index
    %152 = memref.load %arg2[%c8, %c0_78] : memref<10x2xf32, #tpu.memory_space<smem>>
    %153 = vector.broadcast %152 : f32 to vector<1x8xf32>
    %154 = arith.mulf %0, %153 : vector<1x8xf32>
    %c8_79 = arith.constant 8 : index
    %c1_80 = arith.constant 1 : index
    %155 = memref.load %arg2[%c8_79, %c1_80] : memref<10x2xf32, #tpu.memory_space<smem>>
    %156 = vector.broadcast %155 : f32 to vector<1x8xf32>
    %157 = arith.mulf %1, %156 : vector<1x8xf32>
    %158 = arith.addf %154, %157 : vector<1x8xf32>
    %c8_81 = arith.constant 8 : index
    %159 = memref.load %arg3[%c8_81] : memref<10xf32, #tpu.memory_space<smem>>
    %160 = vector.broadcast %159 : f32 to vector<1x8xf32>
    %161 = arith.addf %158, %160 : vector<1x8xf32>
    %cst_82 = arith.constant 0.000000e+00 : f32
    %162 = vector.broadcast %cst_82 : f32 to vector<1x8xf32>
    %163 = arith.maximumf %161, %162 : vector<1x8xf32>
    %c1_83 = arith.constant 1 : index
    %c8_84 = arith.constant 8 : index
    %164 = memref.load %arg4[%c1_83, %c8_84] : memref<2x10xf32, #tpu.memory_space<smem>>
    %c0_85 = arith.constant 0 : index
    %c8_86 = arith.constant 8 : index
    %165 = memref.load %arg4[%c0_85, %c8_86] : memref<2x10xf32, #tpu.memory_space<smem>>
    %166 = arith.subf %164, %165 : f32
    %167 = vector.broadcast %166 : f32 to vector<1x8xf32>
    %168 = arith.mulf %163, %167 : vector<1x8xf32>
    %169 = arith.addf %151, %168 : vector<1x8xf32>
    %c9 = arith.constant 9 : index
    %c0_87 = arith.constant 0 : index
    %170 = memref.load %arg2[%c9, %c0_87] : memref<10x2xf32, #tpu.memory_space<smem>>
    %171 = vector.broadcast %170 : f32 to vector<1x8xf32>
    %172 = arith.mulf %0, %171 : vector<1x8xf32>
    %c9_88 = arith.constant 9 : index
    %c1_89 = arith.constant 1 : index
    %173 = memref.load %arg2[%c9_88, %c1_89] : memref<10x2xf32, #tpu.memory_space<smem>>
    %174 = vector.broadcast %173 : f32 to vector<1x8xf32>
    %175 = arith.mulf %1, %174 : vector<1x8xf32>
    %176 = arith.addf %172, %175 : vector<1x8xf32>
    %c9_90 = arith.constant 9 : index
    %177 = memref.load %arg3[%c9_90] : memref<10xf32, #tpu.memory_space<smem>>
    %178 = vector.broadcast %177 : f32 to vector<1x8xf32>
    %179 = arith.addf %176, %178 : vector<1x8xf32>
    %cst_91 = arith.constant 0.000000e+00 : f32
    %180 = vector.broadcast %cst_91 : f32 to vector<1x8xf32>
    %181 = arith.maximumf %179, %180 : vector<1x8xf32>
    %c1_92 = arith.constant 1 : index
    %c9_93 = arith.constant 9 : index
    %182 = memref.load %arg4[%c1_92, %c9_93] : memref<2x10xf32, #tpu.memory_space<smem>>
    %c0_94 = arith.constant 0 : index
    %c9_95 = arith.constant 9 : index
    %183 = memref.load %arg4[%c0_94, %c9_95] : memref<2x10xf32, #tpu.memory_space<smem>>
    %184 = arith.subf %182, %183 : f32
    %185 = vector.broadcast %184 : f32 to vector<1x8xf32>
    %186 = arith.mulf %181, %185 : vector<1x8xf32>
    %187 = arith.addf %169, %186 : vector<1x8xf32>
    %cst_96 = arith.constant 0.000000e+00 : f32
    %188 = vector.broadcast %cst_96 : f32 to vector<1x8xf32>
    %189 = arith.subf %188, %187 : vector<1x8xf32>
    %190 = math.exp %189 : vector<1x8xf32>
    %cst_97 = arith.constant 1.000000e+00 : f32
    %191 = vector.broadcast %cst_97 : f32 to vector<1x8xf32>
    %192 = arith.addf %191, %190 : vector<1x8xf32>
    %193 = tpu.reciprocal %192 : vector<1x8xf32> -> vector<1x8xf32>
    %cst_98 = arith.constant 1.000000e+00 : f32
    %194 = vector.broadcast %cst_98 : f32 to vector<1x8xf32>
    %195 = arith.subf %194, %193 : vector<1x8xf32>
    %c0_99 = arith.constant 0 : index
    %c0_100 = arith.constant 0 : index
    %196 = vector.load %arg6[%c0_99, %c0_100] : memref<2x8xf32, #tpu.memory_space<vmem>>, vector<1x8xf32>
    tpu.vector_store %arg6[%c0_99, %c0_100], %195 {strides = array<i32>} : memref<2x8xf32, #tpu.memory_space<vmem>>, vector<1x8xf32>,
    %c1_101 = arith.constant 1 : index
    %c0_102 = arith.constant 0 : index
    %197 = vector.load %arg6[%c1_101, %c0_102] : memref<2x8xf32, #tpu.memory_space<vmem>>, vector<1x8xf32>
    tpu.vector_store %arg6[%c1_101, %c0_102], %193 {strides = array<i32>} : memref<2x8xf32, #tpu.memory_space<vmem>>, vector<1x8xf32>,
    return
  }
  func.func @transform_0(%arg0: i32) -> (i32, i32) {
    %c0_i32 = arith.constant 0 : i32
    %c0_i32_0 = arith.constant 0 : i32
    return %c0_i32, %arg0 : i32, i32
  }
  func.func @transform_1(%arg0: i32) -> (i32, i32) {
    %c0_i32 = arith.constant 0 : i32
    %c0_i32_0 = arith.constant 0 : i32
    %c0_i32_1 = arith.constant 0 : i32
    return %c0_i32, %c0_i32_0 : i32, i32
  }
  func.func @transform_2(%arg0: i32) -> i32 {
    %c0_i32 = arith.constant 0 : i32
    %c0_i32_0 = arith.constant 0 : i32
    return %c0_i32 : i32
  }
  func.func @transform_3(%arg0: i32) -> (i32, i32) {
    %c0_i32 = arith.constant 0 : i32
    %c0_i32_0 = arith.constant 0 : i32
    %c0_i32_1 = arith.constant 0 : i32
    return %c0_i32, %c0_i32_0 : i32, i32
  }
  func.func @transform_4(%arg0: i32) -> i32 {
    %c0_i32 = arith.constant 0 : i32
    %c0_i32_0 = arith.constant 0 : i32
    return %c0_i32 : i32
  }
  func.func @transform_5(%arg0: i32) -> (i32, i32) {
    %c0_i32 = arith.constant 0 : i32
    %c0_i32_0 = arith.constant 0 : i32
    return %c0_i32, %arg0 : i32, i32
  }
}

</mosaic_0001>

<bundles_post_ra>
// kernel: net_forward.1
= control target key start
LH: loop header
LB: loop body
LE: loop exit
PB: predicated region body
PF: predicated region fallthrough
CT: control target
= control target key end

     0   :  { %10 = vsyncpa [#allocation4], 0  ;;  %s637_s0 = inlined_call_operand.vmem [shape: f32[2,8], index: 0, kind: input, shape index: {}]   ;;  %s638_s1 = inlined_call_operand.vmem [shape: f32[10,2], index: 1, kind: input, shape index: {}]   ;;  %s639_s2 = inlined_call_operand.vmem [shape: f32[10], index: 2, kind: input, shape index: {}]   ;;  %s640_s3 = inlined_call_operand.vmem [shape: f32[2,10], index: 3, kind: input, shape index: {}]   ;;  %s641_s4 = inlined_call_operand.vmem [shape: f32[2], index: 4, kind: input, shape index: {}]   ;;  %s642_s5 = inlined_call_operand.hbm [shape: f32[2,8], index: 5, kind: output, shape index: {}]  }
   0x1   :  { %11 = vsyncpa [#allocation6], 0 }
   0x2   :  { %12 = vsyncpa [#allocation9], 0  ;;  %s34_s20 = sshll.u32 %s639_s2, 4  ;;  %s35_s20 = int_to_ptr.vmem [resolvable:$true] %s34_s20 }
   0x3   :  { %13 = vsyncpa [#allocation3], 0  ;;  %s21_s23 = sshll.u32 %s638_s1, 4  ;;  %s333_s24 = scalar_lea.vmem %s35_s20, 16  ;;  %s22_s23 = int_to_ptr.vmem [resolvable:$true] %s21_s23 }
   0x4   :  { %p334_p0 = scmp.ne.s32.totalorder %s35_s20, %s333_s24  ;;  %p338_p1 = scmp.lt.s32.totalorder %s35_s20, %s35_s20 }
   0x5   :  { %p339_p2 = scmp.lt.s32.totalorder %s333_s24, %s333_s24 }
   0x7   :  { %p340_p3 = por %p339_p2, %p338_p1 }
   0x9   :  { %p341_p4 = pnand %p340_p3, %p334_p0 }
   0xb   :  { %344 = shalt.err (!%p341_p4)
}
   0xc   :  { %s411_s25 = smov [#allocation5]   ;;  %s345_s26 = scalar_lea.vmem %s22_s23, 256 }
   0xd   :  { %37 = dma.vmem_to_smem %s35_s20, 16, %s411_s25, [#allocation6]  }
   0xe   :  { %p346_p5 = scmp.ne.s32.totalorder %s22_s23, %s345_s26  ;;  %p350_p6 = scmp.lt.s32.totalorder %s22_s23, %s22_s23 }
   0xf   :  { %p351_p7 = scmp.lt.s32.totalorder %s345_s26, %s345_s26 }
  0x11   :  { %p352_p8 = por %p351_p7, %p350_p6 }
  0x13   :  { %p353_p9 = pnand %p352_p8, %p346_p5 }
  0x15   :  { %356 = shalt.err (!%p353_p9)
}
  0x16   :  { %s412_s2 = smov [#allocation2]   ;;  %s413_s27 = smov 128  }
  0x17   :  { %s414_s1 = smov 8   ;;  %s44_s30 = sshll.u32 %s640_s3, 4  ;;  %s45_s30 = int_to_ptr.vmem [resolvable:$true] %s44_s30 }
  0x18   :  { %27 = dma.vmem_to_smem %s22_s23, 256, %s412_s2, [#allocation4], %s413_s27, %s413_s27, %s414_s1  }
  0x19   :  { %s54_s8 = sshll.u32 %s641_s4, 4  ;;  %s357_s9 = scalar_lea.vmem %s45_s30, 32  ;;  %s55_s8 = int_to_ptr.vmem [resolvable:$true] %s54_s8 }
  0x1a   :  { %p358_p10 = scmp.ne.s32.totalorder %s45_s30, %s357_s9  ;;  %p362_p11 = scmp.lt.s32.totalorder %s45_s30, %s45_s30 }
  0x1b   :  { %p363_p12 = scmp.lt.s32.totalorder %s357_s9, %s357_s9 }
  0x1d   :  { %p364_p13 = por %p363_p12, %p362_p11 }
  0x1f   :  { %p365_p0 = pnand %p364_p13, %p358_p10 }
  0x21   :  { %368 = shalt.err (!%p365_p0)
}
  0x22   :  { %s415_s10 = smov [#allocation7]   ;;  %s369_s11 = scalar_lea.vmem %s55_s8, 16 }
  0x23   :  { %47 = dma.vmem_to_smem %s45_s30, 32, %s415_s10, [#allocation6]  }
  0x24   :  { %p370_p1 = scmp.ne.s32.totalorder %s55_s8, %s369_s11  ;;  %p374_p2 = scmp.lt.s32.totalorder %s55_s8, %s55_s8 }
  0x25   :  { %p375_p3 = scmp.lt.s32.totalorder %s369_s11, %s369_s11 }
  0x27   :  { %p376_p4 = por %p375_p3, %p374_p2 }
  0x29   :  { %p377_p5 = pnand %p376_p4, %p370_p1 }
  0x2b   :  { %380 = shalt.err (!%p377_p5)
}
  0x2c   :  { %s416_s3 = smov [#allocation8]  }
  0x2d   :  { %57 = dma.vmem_to_smem %s55_s8, 16, %s416_s3, [#allocation9]  }
  0x2e   :  { %403 = dma.done.wait [#allocation4], 256  }
  0x2f   :  { %404 = vsyncadd [#allocation4], 4294967040 }
  0x30   :  { %405 = dma.done.wait [#allocation6], 48  }
  0x31   :  { %406 = vsyncadd [#allocation6], 4294967248 }
  0x32   :  { %407 = dma.done.wait [#allocation9], 16  }
  0x33   :  { %408 = vsyncadd [#allocation9], 4294967280 }
  0x34   :  { %70 = sfence }
  0x35   :  { %s460_s4 = sld [smem:[#allocation8 + $0x1]]  ;;  %s462_s12 = sld [smem:[#allocation8]]  ;;  %v473_v0 = vld [vmem:[%s637_s0] sm:$0x1]  ;;  %v482_v1 = vld [vmem:[%s637_s0 + $0x1] sm:$0x1] }
  0x36   :  { %s78_s13 = sld [smem:[#allocation2]]  ;;  %s275_s14 = sld [smem:[#allocation2 + $0x1]]  ;;  %vm254_vm0 = vcmask 57344  }
  0x37   :  { %s464_s15 = sld [smem:[#allocation5]]  ;;  %s278_s19 = sld [smem:[#allocation2 + $0x81]] }
  0x38   :  { %s466_s16 = sld [smem:[#allocation7 + $0x80]]  ;;  %s475_s22 = sld [smem:[#allocation5 + $0x1]] }
  0x39   :  { %s468_s17 = sld [smem:[#allocation7]]  ;;  %s477_s23 = sld [smem:[#allocation7 + $0x81]] }
  0x3a   :  { %s277_s18 = sld [smem:[#allocation2 + $0x80]]  ;;  %s484_s26 = sld [smem:[#allocation7 + $0x1]] }
  0x3b   :  { %s282_s2 = sld [smem:[#allocation2 + $0x100]]  ;;  %s75_s27 = ssub.f32 %s460_s4, %s462_s12 }
  0x3c   :  { %v79_v2 = vstv %s78_s13  ;;  %s283_s1 = sld [smem:[#allocation2 + $0x101]]  ;;  %v82_v4 = vstv %s275_s14  ;;  %s489_s28 = sld [smem:[#allocation5 + $0x2]] }
  0x3d   :  { %v80_v3 = vmul.f32 %v79_v2, %v473_v0  ;;  %s491_s29 = sld [smem:[#allocation7 + $0x82]]  ;;  %v83_v5 = vmul.f32 %v82_v4, %v482_v1  ;;  %v86_v6 = vstv %s464_s15  ;;  %v99_v8 = vstv %s278_s19  ;;  %s499_s6 = sld [smem:[#allocation2 + $0x180]] }
  0x3e   :  { %s496_s30 = sld [smem:[#allocation7 + $0x2]]  ;;  %s501_s7 = sld [smem:[#allocation2 + $0x181]]  ;;  %v100_v11 = vmul.f32 %v99_v8, %v482_v1  ;;  %v103_v12 = vstv %s475_s22  ;;  %v76_v20 = vstv %s75_s27 }
  0x3f   :  { %s91_s0 = ssub.f32 %s466_s16, %s468_s17  ;;  %v84_v9 = vadd.f32 %v83_v5, %v80_v3  ;;  %s505_s8 = sld [smem:[#allocation5 + $0x3]] }
  0x40   :  { %v96_v7 = vstv %s277_s18  ;;  %s507_s9 = sld [smem:[#allocation7 + $0x83]]  ;;  %s108_s10 = ssub.f32 %s477_s23, %s484_s26 }
  0x41   :  { %v97_v10 = vmul.f32 %v96_v7, %v473_v0  ;;  %v113_v13 = vstv %s282_s2  ;;  %s512_s11 = sld [smem:[#allocation7 + $0x3]]  ;;  %v87_v14 = vadd.f32 %v86_v6, %v84_v9  ;;  %s515_s3 = sld [smem:[#allocation2 + $0x200]]  ;;  %v92_v18 = vstv %s91_s0 }
  0x42   :  { %v114_v16 = vmul.f32 %v113_v13, %v473_v0  ;;  %v116_v17 = vstv %s283_s1  ;;  %s517_s13 = sld [smem:[#allocation2 + $0x201]]  ;;  %s520_s14 = sld [smem:[#allocation5 + $0x4]]  ;;  %v120_v23 = vstv %s489_s28  ;;  %v109_v24 = vstv %s108_s10 }
  0x43   :  { %v101_v15 = vadd.f32 %v100_v11, %v97_v10  ;;  %v117_v19 = vmul.f32 %v116_v17, %v482_v1  ;;  %s522_s15 = sld [smem:[#allocation7 + $0x84]]  ;;  %v88_v21 = vmax.f32 %v87_v14, 0.0  ;;  %v130_v26 = vstv %s499_s6  ;;  %s534_s18 = sld [smem:[#allocation2 + $0x280]] }
  0x44   :  { %s125_s16 = ssub.f32 %s491_s29, %s496_s30  ;;  %s530_s17 = sld [smem:[#allocation7 + $0x4]]  ;;  %v133_v27 = vstv %s501_s7  ;;  %v131_v30 = vmul.f32 %v130_v26, %v473_v0 }
  0x45   :  { %v104_v22 = vadd.f32 %v103_v12, %v101_v15  ;;  %v118_v25 = vadd.f32 %v117_v19, %v114_v16  ;;  %s536_s19 = sld [smem:[#allocation2 + $0x281]]  ;;  %v93_v28 = vmul.f32 %v92_v18, %v88_v21  ;;  %s539_s4 = sld [smem:[#allocation5 + $0x5]]  ;;  %v134_v33 = vmul.f32 %v133_v27, %v482_v1 }
  0x46   :  { %s541_s12 = sld [smem:[#allocation7 + $0x85]]  ;;  %v126_v32 = vstv %s125_s16  ;;  %v137_v34 = vstv %s505_s8  ;;  %s551_s22 = sld [smem:[#allocation2 + $0x300]] }
  0x47   :  { %v105_v29 = vmax.f32 %v104_v22, 0.0  ;;  %v121_v31 = vadd.f32 %v120_v23, %v118_v25  ;;  %s142_s20 = ssub.f32 %s507_s9, %s512_s11  ;;  %s547_s21 = sld [smem:[#allocation7 + $0x5]]  ;;  %v94_v35 = vadd.f32 %v93_v28, %v76_v20  ;;  %v147_v37 = vstv %s515_s3 }
  0x48   :  { %v150_v38 = vstv %s517_s13  ;;  %s553_s23 = sld [smem:[#allocation2 + $0x301]]  ;;  %v135_v40 = vadd.f32 %v134_v33, %v131_v30  ;;  %v148_v41 = vmul.f32 %v147_v37, %v473_v0  ;;  %s556_s24 = sld [smem:[#allocation5 + $0x6]]  ;;  %v154_v44 = vstv %s520_s14 }
  0x49   :  { %v110_v36 = vmul.f32 %v109_v24, %v105_v29  ;;  %v122_v39 = vmax.f32 %v121_v31, 0.0  ;;  %s558_s25 = sld [smem:[#allocation7 + $0x86]]  ;;  %v151_v43 = vmul.f32 %v150_v38, %v482_v1  ;;  %v164_v47 = vstv %s534_s18  ;;  %s568_s27 = sld [smem:[#allocation2 + $0x380]] }
  0x4a   :  { %s159_s26 = ssub.f32 %s522_s15, %s530_s17  ;;  %s564_s2 = sld [smem:[#allocation7 + $0x6]]  ;;  %v138_v46 = vadd.f32 %v137_v34, %v135_v40  ;;  %v143_v49 = vstv %s142_s20  ;;  %v165_v51 = vmul.f32 %v164_v47, %v473_v0 }
  0x4b   :  { %v111_v42 = vadd.f32 %v110_v36, %v94_v35  ;;  %v127_v45 = vmul.f32 %v126_v32, %v122_v39  ;;  %v167_v48 = vstv %s536_s19  ;;  %s570_s1 = sld [smem:[#allocation2 + $0x381]]  ;;  %v152_v50 = vadd.f32 %v151_v43, %v148_v41  ;;  %s574_s28 = sld [smem:[#allocation5 + $0x7]] }
  0x4c   :  { %v168_v52 = vmul.f32 %v167_v48, %v482_v1  ;;  %s576_s29 = sld [smem:[#allocation7 + $0x87]]  ;;  %v139_v54 = vmax.f32 %v138_v46, 0.0  ;;  %v171_v55 = vstv %s539_s4  ;;  %v181_v58 = vstv %s551_s22  ;;  %s585_s6 = sld [smem:[#allocation2 + $0x400]] }
  0x4d   :  { %v128_v53 = vadd.f32 %v127_v45, %v111_v42  ;;  %s176_s0 = ssub.f32 %s541_s12, %s547_s21  ;;  %s581_s30 = sld [smem:[#allocation7 + $0x7]]  ;;  %v155_v56 = vadd.f32 %v154_v44, %v152_v50  ;;  %v160_v61 = vstv %s159_s26  ;;  %v182_v62 = vmul.f32 %v181_v58, %v473_v0 }
  0x4e   :  { %v169_v57 = vadd.f32 %v168_v52, %v165_v51  ;;  %v184_v59 = vstv %s553_s23  ;;  %s587_s7 = sld [smem:[#allocation2 + $0x401]]  ;;  %v144_v60 = vmul.f32 %v143_v49, %v139_v54  ;;  %s591_s8 = sld [smem:[#allocation5 + $0x8]]  ;;  %v188_v5 = vstv %s556_s24 }
  0x4f   :  { %v185_v63 = vmul.f32 %v184_v59, %v482_v1  ;;  %s593_s9 = sld [smem:[#allocation7 + $0x88]]  ;;  %v156_v2 = vmax.f32 %v155_v56, 0.0  ;;  %v177_v4 = vstv %s176_s0  ;;  %v198_v8 = vstv %s568_s27  ;;  %s318_s13 = sld [smem:[#allocation2 + $0x481]] }
  0x50   :  { %v172_v3 = vadd.f32 %v171_v55, %v169_v57  ;;  %s193_s10 = ssub.f32 %s558_s25, %s564_s2  ;;  %s598_s11 = sld [smem:[#allocation7 + $0x8]]  ;;  %v145_v6 = vadd.f32 %v144_v60, %v128_v53  ;;  %v199_v12 = vmul.f32 %v198_v8, %v473_v0 }
  0x51   :  { %v186_v7 = vadd.f32 %v185_v63, %v182_v62  ;;  %v201_v9 = vstv %s570_s1  ;;  %s317_s3 = sld [smem:[#allocation2 + $0x480]]  ;;  %v161_v10 = vmul.f32 %v160_v61, %v156_v2  ;;  %s603_s14 = sld [smem:[#allocation5 + $0x9]]  ;;  %v205_v16 = vstv %s574_s28 }
  0x52   :  { %v173_v11 = vmax.f32 %v172_v3, 0.0  ;;  %s605_s15 = sld [smem:[#allocation7 + $0x89]]  ;;  %v194_v14 = vstv %s193_s10  ;;  %v202_v15 = vmul.f32 %v201_v9, %v482_v1  ;;  %v215_v19 = vstv %s585_s6  ;;  %s417_s4 = smov [#allocation10]  }
  0x53   :  { %v189_v13 = vadd.f32 %v188_v5, %v186_v7  ;;  %s609_s16 = sld [smem:[#allocation7 + $0x9]]  ;;  %v162_v17 = vadd.f32 %v161_v10, %v145_v6  ;;  %s210_s17 = ssub.f32 %s576_s29, %s581_s30  ;;  %v216_v23 = vmul.f32 %v215_v19, %v473_v0 }
  0x54   :  { %v178_v18 = vmul.f32 %v177_v4, %v173_v11  ;;  %v218_v20 = vstv %s587_s7  ;;  %v203_v22 = vadd.f32 %v202_v15, %v199_v12  ;;  %v222_v26 = vstv %s591_s8  ;;  %s263_s12 = sshll.u32 %s417_s4, 4  ;;  %s264_s12 = int_to_ptr.vmem [resolvable:$true] %s263_s12 }
  0x55   :  { %v190_v21 = vmax.f32 %v189_v13, 0.0  ;;  %v219_v25 = vmul.f32 %v218_v20, %v482_v1  ;;  %v235_v30 = vstv %s318_s13  ;;  %v211_v31 = vstv %s210_s17  ;;  %s381_s20 = scalar_lea.vmem %s264_s12, 32  ;;  %p386_p7 = scmp.lt.s32.totalorder %s264_s12, %s264_s12 }
  0x56   :  { %v179_v24 = vadd.f32 %v178_v18, %v162_v17  ;;  %v206_v28 = vadd.f32 %v205_v16, %v203_v22  ;;  %s227_s18 = ssub.f32 %s593_s9, %s598_s11  ;;  %v236_v34 = vmul.f32 %v235_v30, %v482_v1  ;;  %p382_p6 = scmp.ne.s32.totalorder %s264_s12, %s381_s20 }
  0x57   :  { %v195_v27 = vmul.f32 %v194_v14, %v190_v21  ;;  %v232_v29 = vstv %s317_s3  ;;  %v220_v32 = vadd.f32 %v219_v25, %v216_v23  ;;  %v239_v37 = vstv %s603_s14  ;;  %p387_p8 = scmp.lt.s32.totalorder %s381_s20, %s381_s20 }
  0x58   :  { %v233_v33 = vmul.f32 %v232_v29, %v473_v0  ;;  %v207_v36 = vmax.f32 %v206_v28, 0.0  ;;  %v228_v41 = vstv %s227_s18 }
  0x59   :  { %v196_v35 = vadd.f32 %v195_v27, %v179_v24  ;;  %s244_s19 = ssub.f32 %s605_s15, %s609_s16  ;;  %v223_v38 = vadd.f32 %v222_v26, %v220_v32  ;;  %p388_p9 = por %p387_p8, %p386_p7 }
  0x5a   :  { %v237_v39 = vadd.f32 %v236_v34, %v233_v33  ;;  %v212_v40 = vmul.f32 %v211_v31, %v207_v36 }
  0x5b   :  { %v224_v42 = vmax.f32 %v223_v38, 0.0  ;;  %v245_v45 = vstv %s244_s19  ;;  %p389_p10 = pnand %p388_p9, %p382_p6 }
  0x5c   :  { %v240_v43 = vadd.f32 %v239_v37, %v237_v39  ;;  %v213_v44 = vadd.f32 %v212_v40, %v196_v35 }
  0x5d   :  { %v229_v46 = vmul.f32 %v228_v41, %v224_v42 }
  0x5e   :  { %v241_v47 = vmax.f32 %v240_v43, 0.0 }
  0x5f   :  { %v230_v48 = vadd.f32 %v229_v46, %v213_v44 }
  0x60   :  { %v246_v49 = vmul.f32 %v245_v45, %v241_v47 }
  0x62   :  { %v247_v50 = vadd.f32 %v246_v49, %v230_v48 }
  0x64   :  { %v248_v0 = vsub.f32 0.0, %v247_v50 }
  0x66   :  { %v249_v51 = vmul.f32 1.442695, %v248_v0 }
  0x68   :  { %329 = vpow2.f32 %v249_v51 }
  0x72   :  { %v330_v1 = vpop.eup %329 }
  0x73   :  { %v251_v52 = vadd.f32 1.0, %v330_v1 }
  0x75   :  { %331 = vrcp.f32 %v251_v52 }
  0x7f   :  { %v332_v53 = vpop.eup %331 }
  0x80   :  { %v253_v54 = vsub.f32 1.0, %v332_v53  ;;  %256 = vst.msk [vmem:[#allocation10 + $0x1] sm:$0x1] %vm254_vm0, %v332_v53 }
  0x82   :  { %255 = vst.msk [vmem:[#allocation10] sm:$0x1] %vm254_vm0, %v253_v54 }
  0x83   :  { %392 = shalt.err (!%p389_p10)
}
  0x84   :  { %s393_s23 = scalar_lea.hbm %s642_s5, 32 }
  0x85   :  { %p394_p11 = scmp.ne.s32.totalorder %s642_s5, %s393_s23  ;;  %p397_p12 = scmp.lt.u32.totalorder %s393_s23, %s642_s5 }
  0x87   :  { %p399_p13 = pnand %p397_p12, %p394_p11 }
  0x89   :  { %402 = shalt.err (!%p399_p13)
}
  0x8a   :  { %266 = dma.vmem_to_hbm [thread:$0]  %s264_s12, 32, %s642_s5, [#allocation3]  }
  0x8b   :  { %409 = dma.done.wait [#allocation3], 32  }
  0x8c   :  { %410 = vsyncadd [#allocation3], 4294967264 }
  0x8d   :  { %270 = vsyncpa [#allocation3], 1 }
  0x8e   :  { %271 = vsyncpa [#allocation4], 1 }
  0x8f   :  { %272 = vsyncpa [#allocation6], 1 }
  0x90   :  { %273 = vsyncpa [#allocation9], 1 }

</bundles_post_ra>
